<compile_context>
chip_gen: v5e
topology: v5e:2x2
jax: 0.10.0
libtpu: 0.0.40
codegen_flags: <defaults>
</compile_context>

<pallas_src>
import functools

import jax
import jax.numpy as jnp
from jax.experimental import pallas as pl
from jax.experimental.pallas import tpu as pltpu


# --------------------------------------------------------------------------- #
# Kernels
# --------------------------------------------------------------------------- #
def _ctx_rows_kernel(h_ref, busy_ref, time_ref, w_ref, o_ref, *, inv_scale):
    # h_ref: (Rt, E)   busy_ref / time_ref: (Rt, 1)   w_ref: (1, E)
    busy_for = (busy_ref[...] - time_ref[...]) * inv_scale            # (Rt, 1) f32
    proj = busy_for * w_ref[...]                                      # (Rt, E): sublane x lane broadcast, pure VPU
    o_ref[...] = (h_ref[...].astype(jnp.float32) + proj).astype(o_ref.dtype)


def _ctx_flat_kernel(h_ref, busy_ref, time_ref, wexp_ref, o_ref, *, inv_scale):
    # h_ref: (Bt, F=M*E)   busy_ref: (Bt, M)   time_ref: (Bt, 1)   wexp_ref: (M, F)
    busy_for = (busy_ref[...] - time_ref[...]) * inv_scale            # (Bt, M) f32
    # Tiny-K MXU matmul replaces the old M-way compare/select expansion.
    proj = jnp.dot(busy_for, wexp_ref[...], preferred_element_type=jnp.float32)  # (Bt, F)
    o_ref[...] = (h_ref[...].astype(jnp.float32) + proj).astype(o_ref.dtype)


# --------------------------------------------------------------------------- #
# Tiling / VMEM helpers
# --------------------------------------------------------------------------- #
def _device_caps():
    """(max_tile_bytes, vmem_limit_cap_bytes) — generation-aware."""
    kind = ""
    try:
        kind = jax.devices()[0].device_kind.lower()
    except Exception:
        pass
    if "v7" in kind:
        # v7x: 64 MiB VMEM per TC -> keep double-buffered tiles + temps well clear.
        return 3 << 20, 40 << 20
    # v5e / v6e: 128 MiB VMEM -> bigger tiles, fewer grid steps.
    return 6 << 20, 64 << 20


def _pick_row_tile(n_rows, row_bytes, max_tile_bytes, sublane):
    """Return (rows_per_tile, n_grid_steps). Single step when everything fits."""
    total = n_rows * row_bytes
    if total <= max_tile_bytes or n_rows <= sublane:
        return n_rows, 1                          # full-extent block, zero tiling overhead
    rows = max(sublane, (max_tile_bytes // max(1, row_bytes)) // sublane * sublane)
    rows = min(rows, n_rows)
    return rows, pl.cdiv(n_rows, rows)            # partial last block is masked by Pallas


def _vmem_limit(tile_bytes, tile_elems, cap):
    # 2x double-buffered input tile + 2x output tile + ~3x f32 temporaries + slack.
    need = 4 * tile_bytes + 3 * tile_elems * 4 + (2 << 20)
    return int(min(cap, max(16 << 20, need)))


# --------------------------------------------------------------------------- #
# Forward wrapper
# --------------------------------------------------------------------------- #
def scheduling_context_forward(h, busy_until, time, w, scaling_factor=1000.0,
                               *, donate_h=False, max_tile_bytes=None):
    """h: [B, M, E], busy_until: [B, M], time: [B], w: [E] (proj_busy weight, no bias)."""
    B, M, E = h.shape
    inv_scale = 1.0 / float(scaling_factor)
    itemsize = jnp.dtype(h.dtype).itemsize
    sublane = 16 if itemsize == 2 else 8

    tile_cap, vmem_cap = _device_caps()
    if max_tile_bytes is not None:
        tile_cap = int(max_tile_bytes)

    busy2d = jnp.asarray(busy_until).reshape(B, M).astype(jnp.float32)
    time1d = jnp.asarray(time).reshape(B).astype(jnp.float32)
    w_flat = jnp.asarray(w).reshape(-1).astype(jnp.float32)            # (E,)

    io_alias = {0: 0} if donate_h else {}

    # Lane-dense path when E is not a multiple of 128: flatten (M, E) -> F = M*E
    # and expand the projection with a tiny (Bt, M) @ (M, F) MXU matmul.
    use_flat = (E % 128 != 0) and ((M * E) % 128 == 0)

    if use_flat:
        F = M * E
        h2d = h.reshape(B, F)                                          # contiguous, free
        # Row m of w_expand holds w in lanes [m*E, (m+1)*E), zeros elsewhere.
        w_expand = (jnp.eye(M, dtype=jnp.float32)[:, :, None]
                    * w_flat[None, None, :]).reshape(M, F)
        time2d = time1d.reshape(B, 1)

        bt, steps = _pick_row_tile(B, F * itemsize, tile_cap, sublane)
        tile_elems = bt * F
        compiler_params = pltpu.CompilerParams(
            dimension_semantics=("parallel",),
            vmem_limit_bytes=_vmem_limit(tile_elems * itemsize, tile_elems, vmem_cap),
        )
        out = pl.pallas_call(
            functools.partial(_ctx_flat_kernel, inv_scale=inv_scale),
            out_shape=jax.ShapeDtypeStruct((B, F), h.dtype),
            grid=(steps,),
            in_specs=[
                pl.BlockSpec((bt, F), lambda b: (b, 0)),               # h (flattened)
                pl.BlockSpec((bt, M), lambda b: (b, 0)),               # busy_until
                pl.BlockSpec((bt, 1), lambda b: (b, 0)),               # time
                pl.BlockSpec((M, F), lambda b: (0, 0)),                # expanded weight (fetched once)
            ],
            out_specs=pl.BlockSpec((bt, F), lambda b: (b, 0)),
            compiler_params=compiler_params,
            input_output_aliases=io_alias,
        )(h2d, busy2d, time2d, w_expand)
        return out.reshape(B, M, E)

    # Default: row-collapsed layout (B*M, E) — rows on sublanes, E on lanes.
    R = B * M
    h2d = h.reshape(R, E)
    busy_row = busy2d.reshape(R, 1)
    time_row = jnp.broadcast_to(time1d[:, None], (B, M)).reshape(R, 1)
    w2d = w_flat.reshape(1, E)

    rt, steps = _pick_row_tile(R, E * itemsize, tile_cap, sublane)
    tile_elems = rt * E
    compiler_params = pltpu.CompilerParams(
        # NOTE: on v7x the row axis can additionally be split across the two
        # TensorCores (CORE_PARALLEL / core_map) if a profile shows one core idle.
        dimension_semantics=("parallel",),
        vmem_limit_bytes=_vmem_limit(tile_elems * itemsize, tile_elems, vmem_cap),
    )
    out = pl.pallas_call(
        functools.partial(_ctx_rows_kernel, inv_scale=inv_scale),
        out_shape=jax.ShapeDtypeStruct((R, E), h.dtype),
        grid=(steps,),
        in_specs=[
            pl.BlockSpec((rt, E), lambda b: (b, 0)),                   # h rows
            pl.BlockSpec((rt, 1), lambda b: (b, 0)),                   # busy_until per row
            pl.BlockSpec((rt, 1), lambda b: (b, 0)),                   # time per row
            pl.BlockSpec((1, E), lambda b: (0, 0)),                    # proj_busy weight (fetched once)
        ],
        out_specs=pl.BlockSpec((rt, E), lambda b: (b, 0)),
        compiler_params=compiler_params,
        input_output_aliases=io_alias,
    )(h2d, busy_row, time_row, w2d)
    return out.reshape(B, M, E)


# --------------------------------------------------------------------------- #
# Reference + tests
# --------------------------------------------------------------------------- #
def scheduling_context_ref(h, busy_until, time, w, scaling_factor=1000.0):
    busy_for = (busy_until.astype(jnp.float32)
                - time.reshape(-1, 1).astype(jnp.float32)) / scaling_factor    # [B, M]
    proj = busy_for[..., None] * w.reshape(-1).astype(jnp.float32)[None, None, :]
    return (h.astype(jnp.float32) + proj).astype(h.dtype)


def _run_case(key, B, M, E, dtype, atol, **fwd_kwargs):
    k_h, k_busy, k_time, k_w = jax.random.split(key, 4)
    h = jax.random.normal(k_h, (B, M, E), dtype=jnp.float32).astype(dtype)
    busy = jax.random.uniform(k_busy, (B, M), dtype=jnp.float32) * 500.0
    time = jax.random.uniform(k_time, (B,), dtype=jnp.float32) * 100.0
    w = (jax.random.uniform(k_w, (E,), dtype=jnp.float32) - 0.5) * 2.0

    out = jax.block_until_ready(
        scheduling_context_forward(h, busy, time, w, 1000.0, **fwd_kwargs))
    ref = scheduling_context_ref(h, busy, time, w, 1000.0)

    assert out.shape == (B, M, E)
    assert out.dtype == dtype
    assert jnp.allclose(out.astype(jnp.float32), ref.astype(jnp.float32),
                        atol=atol, rtol=1e-3)
    return h, busy, time, w, ref


if __name__ == "__main__":
    key = jax.random.PRNGKey(0)
    k1, k2, k3, k4, k5 = jax.random.split(key, 5)

    # 1) rl4co default (embed_dim=128), f32: row-collapsed path, single grid step.
    h, busy, time, w, ref = _run_case(k1, 8, 8, 128, jnp.float32, 1e-5)

    # 2) Same case with h's HBM buffer donated / aliased to the output.
    fwd_donate = jax.jit(
        functools.partial(scheduling_context_forward, scaling_factor=1000.0, donate_h=True),
        donate_argnums=(0,),
    )
    out_donated = jax.block_until_ready(fwd_donate(h + 0.0, busy, time, w))
    assert jnp.allclose(out_donated, ref, atol=1e-5, rtol=1e-3)

    # 3) E < 128: lane-dense flat path, projection expanded via tiny MXU matmul.
    _run_case(k2, 8, 8, 32, jnp.float32, 1e-5)

    # 4) bf16 embeddings: f32 math in-kernel, cast on store; small M packs densely.
    _run_case(k3, 8, 8, 128, jnp.bfloat16, 2e-2)

    # 5) Multi-step grid (forced tiny tile cap), row tiles divide evenly.
    _run_case(k4, 16, 8, 128, jnp.float32, 1e-5, max_tile_bytes=8 << 10)

    # 6) Multi-step grid with a partial (masked) last block: 72 rows, 16-row tiles.
    _run_case(k5, 9, 8, 128, jnp.float32, 1e-5, max_tile_bytes=8 << 10)

    print("KERNEL_OK")
</pallas_src>

<mosaic_0001>
module attributes {stable_mosaic.version = 11 : i64} {
  func.func @_ctx_rows_kernel(%arg0: i32, %arg1: memref<64x128xf32, #tpu.memory_space<vmem>>, %arg2: memref<64x1xf32, #tpu.memory_space<vmem>>, %arg3: memref<64x1xf32, #tpu.memory_space<vmem>>, %arg4: memref<1x128xf32, #tpu.memory_space<vmem>>, %arg5: memref<64x128xf32, #tpu.memory_space<vmem>>) attributes {dimension_semantics = [#tpu.dimension_semantics<parallel>], iteration_bounds = array<i64: 1>, scalar_prefetch = 0 : i64, scratch_operands = 0 : i64, tpu.core_type = #tpu.core_type<tc>, window_params = [{transform_indices = @transform_0, window_bounds = array<i64: 64, 128>}, {transform_indices = @transform_1, window_bounds = array<i64: 64, 1>}, {transform_indices = @transform_2, window_bounds = array<i64: 64, 1>}, {pipeline_mode = #tpu.pipeline_mode<synchronous>, transform_indices = @transform_3, window_bounds = array<i64: 1, 128>}, {transform_indices = @transform_4, window_bounds = array<i64: 64, 128>}]} {
    %c0 = arith.constant 0 : index
    %c0_0 = arith.constant 0 : index
    %0 = vector.load %arg2[%c0, %c0_0] : memref<64x1xf32, #tpu.memory_space<vmem>>, vector<64x1xf32>
    %c0_1 = arith.constant 0 : index
    %c0_2 = arith.constant 0 : index
    %1 = vector.load %arg3[%c0_1, %c0_2] : memref<64x1xf32, #tpu.memory_space<vmem>>, vector<64x1xf32>
    %2 = arith.subf %0, %1 : vector<64x1xf32>
    %cst = arith.constant 1.000000e-03 : f32
    %3 = vector.broadcast %cst : f32 to vector<64x1xf32>
    %4 = arith.mulf %2, %3 : vector<64x1xf32>
    %c0_3 = arith.constant 0 : index
    %c0_4 = arith.constant 0 : index
    %5 = vector.load %arg4[%c0_3, %c0_4] : memref<1x128xf32, #tpu.memory_space<vmem>>, vector<1x128xf32>
    %6 = vector.broadcast %4 : vector<64x1xf32> to vector<64x128xf32>
    %7 = vector.broadcast %5 : vector<1x128xf32> to vector<64x128xf32>
    %8 = arith.mulf %6, %7 : vector<64x128xf32>
    %c0_5 = arith.constant 0 : index
    %c0_6 = arith.constant 0 : index
    %9 = vector.load %arg1[%c0_5, %c0_6] : memref<64x128xf32, #tpu.memory_space<vmem>>, vector<64x128xf32>
    %10 = arith.addf %9, %8 : vector<64x128xf32>
    %c0_7 = arith.constant 0 : index
    %c0_8 = arith.constant 0 : index
    %11 = vector.load %arg5[%c0_7, %c0_8] : memref<64x128xf32, #tpu.memory_space<vmem>>, vector<64x128xf32>
    tpu.vector_store %arg5[%c0_7, %c0_8], %10 {strides = array<i32>} : memref<64x128xf32, #tpu.memory_space<vmem>>, vector<64x128xf32>,
    return
  }
  func.func @transform_0(%arg0: i32) -> (i32, i32) {
    %c0_i32 = arith.constant 0 : i32
    %c0_i32_0 = arith.constant 0 : i32
    return %arg0, %c0_i32 : i32, i32
  }
  func.func @transform_1(%arg0: i32) -> (i32, i32) {
    %c0_i32 = arith.constant 0 : i32
    %c0_i32_0 = arith.constant 0 : i32
    return %arg0, %c0_i32 : i32, i32
  }
  func.func @transform_2(%arg0: i32) -> (i32, i32) {
    %c0_i32 = arith.constant 0 : i32
    %c0_i32_0 = arith.constant 0 : i32
    return %arg0, %c0_i32 : i32, i32
  }
  func.func @transform_3(%arg0: i32) -> (i32, i32) {
    %c0_i32 = arith.constant 0 : i32
    %c0_i32_0 = arith.constant 0 : i32
    %c0_i32_1 = arith.constant 0 : i32
    return %c0_i32, %c0_i32_0 : i32, i32
  }
  func.func @transform_4(%arg0: i32) -> (i32, i32) {
    %c0_i32 = arith.constant 0 : i32
    %c0_i32_0 = arith.constant 0 : i32
    return %arg0, %c0_i32 : i32, i32
  }
}

</mosaic_0001>

<bundles_post_ra>
// kernel: tpu_custom_call.1
= control target key start
LH: loop header
LB: loop body
LE: loop exit
PB: predicated region body
PF: predicated region fallthrough
CT: control target
= control target key end

     0   :  { %v178_v3 = vmov 0   ;;  %s285_s0 = inlined_call_operand.vmem [shape: f32[64,128], index: 0, kind: input, shape index: {}]   ;;  %s286_s1 = inlined_call_operand.vmem [shape: f32[64,1], index: 1, kind: input, shape index: {}]   ;;  %s287_s2 = inlined_call_operand.vmem [shape: f32[64,1], index: 2, kind: input, shape index: {}]   ;;  %s288_s3 = inlined_call_operand.vmem [shape: f32[1,128], index: 3, kind: input, shape index: {}]   ;;  %s289_s4 = inlined_call_operand.hbm [shape: f32[64,128], index: 4, kind: output, shape index: {}]  }
   0x1   :  { %v20_v0 = vld [vmem:[%s286_s1 + $0x10] sm:$0xff]  ;;  %v18_v2 = vld [vmem:[%s286_s1] sm:$0xff]  ;;  %149 = vset.pattern.permute.xlu1 %v178_v3  ;;  %148 = vset.pattern.permute.xlu0 %v178_v3  ;;  %v21_v7 = vld [vmem:[%s286_s1 + $0x18] sm:$0xff] }
   0x2   :  { %v28_v1 = vld [vmem:[%s287_s2 + $0x10] sm:$0xff]  ;;  %v26_v5 = vld [vmem:[%s287_s2] sm:$0xff]  ;;  %v29_v8 = vld [vmem:[%s287_s2 + $0x18] sm:$0xff]  ;;  %150 = vset.pattern.permute.xlu2 %v178_v3 }
   0x3   :  { %v36_v4 = vsub.f32 %v20_v0, %v28_v1  ;;  %v34_v6 = vsub.f32 %v18_v2, %v26_v5  ;;  %v19_v10 = vld [vmem:[%s286_s1 + $0x8] sm:$0xff]  ;;  %v22_v13 = vld [vmem:[%s286_s1 + $0x20] sm:$0xff]  ;;  %v37_v15 = vsub.f32 %v21_v7, %v29_v8 }
   0x4   :  { %v27_v11 = vld [vmem:[%s287_s2 + $0x8] sm:$0xff]  ;;  %v30_v14 = vld [vmem:[%s287_s2 + $0x20] sm:$0xff] }
   0x5   :  { %v44_v9 = vmul.f32 0.001, %v36_v4  ;;  %v42_v12 = vmul.f32 0.001, %v34_v6  ;;  %v38_v16 = vsub.f32 %v22_v13, %v30_v14  ;;  %v35_v17 = vsub.f32 %v19_v10, %v27_v11  ;;  %v23_v18 = vld [vmem:[%s286_s1 + $0x28] sm:$0xff] }
   0x6   :  { %v31_v19 = vld [vmem:[%s287_s2 + $0x28] sm:$0xff] }
   0x7   :  { %63 = vperm.xlu1 %149, %v44_v9   ;;  %53 = vperm.xlu0 %148, %v42_v12   ;;  %v46_v20 = vmul.f32 0.001, %v38_v16 }
   0x8   :  { %9 = vsyncpa [#allocation3], 0  ;;  %v45_v21 = vmul.f32 0.001, %v37_v15  ;;  %v39_v22 = vsub.f32 %v23_v18, %v31_v19  ;;  %v43_v23 = vmul.f32 0.001, %v35_v17 }
   0x9   :  { %73 = vperm.xlu2 %150, %v46_v20   ;;  %v25_v24 = vld [vmem:[%s286_s1 + $0x38] sm:$0xff]  ;;  %v24_v26 = vld [vmem:[%s286_s1 + $0x30] sm:$0xff]  ;;  %v151_v33 = vld [vmem:[%s288_s3] ss:$0 sm:$0xff]  ;;  %s179_s8 = smov [#allocation2]   ;;  %s132_s12 = sshll.u32 %s289_s4, 4  ;;  %s133_s12 = int_to_ptr.hbm [resolvable:$true] %s132_s12 }
   0xa   :  { %v33_v25 = vld [vmem:[%s287_s2 + $0x38] sm:$0xff]  ;;  %v32_v27 = vld [vmem:[%s287_s2 + $0x30] sm:$0xff]  ;;  %v47_v29 = vmul.f32 0.001, %v39_v22  ;;  %v106_v34 = vld [vmem:[%s285_s0 + $0x20] sm:$0xff]  ;;  %s130_s9 = sshll.u32 %s179_s8, 4  ;;  %s131_s9 = int_to_ptr.vmem [resolvable:$true] %s130_s9 }
   0xb   :  { %v41_v28 = vsub.f32 %v25_v24, %v33_v25  ;;  %v40_v30 = vsub.f32 %v24_v26, %v32_v27  ;;  %v107_v38 = vld [vmem:[%s285_s0 + $0x28] sm:$0xff]  ;;  %v104_v42 = vld [vmem:[%s285_s0 + $0x10] sm:$0xff]  ;;  %v102_v45 = vld [vmem:[%s285_s0] sm:$0xff]  ;;  %s180_s15 = smov 128   ;;  %s181_s16 = smov 8  }
   0xc   :  { %v105_v50 = vld [vmem:[%s285_s0 + $0x18] sm:$0xff]  ;;  %v103_v53 = vld [vmem:[%s285_s0 + $0x8] sm:$0xff]  ;;  %v108_v61 = vld [vmem:[%s285_s0 + $0x30] sm:$0xff] }
   0xd   :  { %v49_v31 = vmul.f32 0.001, %v41_v28  ;;  %v48_v32 = vmul.f32 0.001, %v40_v30  ;;  %v109_v58 = vld [vmem:[%s285_s0 + $0x38] sm:$0xff] }
   0xf   :  { %68 = vperm.xlu1 %149, %v45_v21   ;;  %58 = vperm.xlu0 %148, %v43_v23  }
  0x11   :  { %78 = vperm.xlu2 %150, %v47_v29  }
  0x17   :  { %88 = vperm.xlu1 %149, %v49_v31   ;;  %83 = vperm.xlu0 %148, %v48_v32  }
  0x63   :  { %v74_v35 = vpop.permute.xlu2 %73 }
  0x64   :  { %v98_v36 = vmul.f32 %v151_v33, %v74_v35 }
  0x66   :  { %v114_v37 = vadd.f32 %v106_v34, %v98_v36 }
  0x68   :  { %122 = vst [vmem:[#allocation2 + $0x20] sm:$0xff] %v114_v37 }
  0x6b   :  { %v79_v39 = vpop.permute.xlu2 %78 }
  0x6c   :  { %v99_v40 = vmul.f32 %v151_v33, %v79_v39 }
  0x6e   :  { %v115_v41 = vadd.f32 %v107_v38, %v99_v40 }
  0x70   :  { %123 = vst [vmem:[#allocation2 + $0x28] sm:$0xff] %v115_v41 }
  0x79   :  { %v64_v43 = vpop.permute.xlu1 %63  ;;  %v54_v46 = vpop.permute.xlu0 %53 }
  0x7a   :  { %v96_v44 = vmul.f32 %v151_v33, %v64_v43  ;;  %v94_v47 = vmul.f32 %v151_v33, %v54_v46 }
  0x7c   :  { %v112_v48 = vadd.f32 %v104_v42, %v96_v44  ;;  %v110_v49 = vadd.f32 %v102_v45, %v94_v47 }
  0x7e   :  { %120 = vst [vmem:[#allocation2 + $0x10] sm:$0xff] %v112_v48 }
  0x7f   :  { %118 = vst [vmem:[#allocation2] sm:$0xff] %v110_v49 }
  0x81   :  { %v69_v51 = vpop.permute.xlu1 %68  ;;  %v59_v54 = vpop.permute.xlu0 %58 }
  0x82   :  { %v97_v52 = vmul.f32 %v151_v33, %v69_v51  ;;  %v95_v55 = vmul.f32 %v151_v33, %v59_v54 }
  0x84   :  { %v113_v56 = vadd.f32 %v105_v50, %v97_v52  ;;  %v111_v57 = vadd.f32 %v103_v53, %v95_v55 }
  0x86   :  { %121 = vst [vmem:[#allocation2 + $0x18] sm:$0xff] %v113_v56 }
  0x87   :  { %119 = vst [vmem:[#allocation2 + $0x8] sm:$0xff] %v111_v57 }
  0x89   :  { %v89_v59 = vpop.permute.xlu1 %88  ;;  %v84_v62 = vpop.permute.xlu0 %83 }
  0x8a   :  { %v101_v60 = vmul.f32 %v151_v33, %v89_v59  ;;  %v100_v63 = vmul.f32 %v151_v33, %v84_v62 }
  0x8c   :  { %v117_v0 = vadd.f32 %v109_v58, %v101_v60  ;;  %v116_v1 = vadd.f32 %v108_v61, %v100_v63 }
  0x8e   :  { %125 = vst [vmem:[#allocation2 + $0x38] sm:$0xff] %v117_v0 }
  0x8f   :  { %124 = vst [vmem:[#allocation2 + $0x30] sm:$0xff] %v116_v1 }
  0x90   :  { %138 = dma.vmem_to_hbm [thread:$0]  %s131_s9, 1024, %s133_s12, [#allocation3], %s180_s15, %s180_s15, %s181_s16  }
  0x91   :  { %176 = dma.done.wait [#allocation3], 1024  }
  0x92   :  { %177 = vsyncadd [#allocation3], 4294966272 }
  0x93   :  { %143 = vsyncpa [#allocation3], 1 }

</bundles_post_ra>
